<compile_context>
chip_gen: v7x
topology: tpu7x:2x2x1
jax: 0.10.0
libtpu: 0.0.40
codegen_flags: <defaults>
</compile_context>

<pallas_src>
import jax
import jax.numpy as jnp
from jax import lax
from jax.experimental import pallas as pl
from jax.experimental.pallas import tpu as pltpu

REL_THR = 0.7
REP_THR = 0.7
PAD = 3          # MaxPool2d(kernel_size=7, stride=1, padding=3) -> "same" output
TOP = 8          # sublane-aligned top halo inside the VMEM scratch (>= PAD)


def _round_up(x, m):
    return (x + m - 1) // m * m


def _nms_kernel(rel_ref, rep_ref, out_ref, s_ref, t_ref):
    _, H, W = rep_ref.shape                  # unpadded plane block (1, H, W)
    HP, WP = s_ref.shape                     # padded scratch plane
    neg = jnp.float32(-jnp.inf)

    # ---- Build the -inf-padded plane in VMEM (halo written in-kernel). ----
    # All halo stores start at sublane/lane-aligned offsets; the interior
    # store (last) overwrites any aligned-rounding overlap.
    w_al = (W // 128) * 128                  # aligned start of right halo
    h_al = TOP + (H // 8) * 8                # aligned start of bottom halo
    s_ref[0:TOP, :] = jnp.full((TOP, WP), neg, jnp.float32)                 # top
    s_ref[h_al:HP, :] = jnp.full((HP - h_al, WP), neg, jnp.float32)         # bottom
    s_ref[TOP:TOP + H, w_al:WP] = jnp.full((H, WP - w_al), neg, jnp.float32)  # right
    s_ref[TOP:TOP + H, 0:W] = rep_ref[0]                                    # valid data

    # ---- Row (sublane) pass: 7-tap sliding max via shifted VMEM reads. ----
    # Ping-pong between s_ref / t_ref so no statement reads and writes the
    # same buffer.  After the three steps: t3[i] = max(x[i .. i+6]).
    t_ref[0:HP - 1, :] = jnp.maximum(s_ref[0:HP - 1, :], s_ref[1:HP, :])
    s_ref[0:HP - 3, :] = jnp.maximum(t_ref[0:HP - 3, :], t_ref[2:HP - 1, :])
    t_ref[0:HP - 6, :] = jnp.maximum(s_ref[0:HP - 6, :], s_ref[3:HP - 3, :])

    # Row-pooled value centered on each valid row r: t3[TOP + r - PAD].
    rm = t_ref[TOP - PAD:TOP - PAD + H, :]   # (H, WP); cols >= W stay -inf

    # ---- Column (lane) pass: log-doubling rolls; wrap hits the -inf halo. --
    n = WP
    c1 = jnp.maximum(rm, pltpu.roll(rm, shift=n - 1, axis=1))   # rm[:, j+1]
    c2 = jnp.maximum(c1, pltpu.roll(c1, shift=n - 2, axis=1))   # c1[:, j+2]
    c3 = jnp.maximum(c2, pltpu.roll(c2, shift=n - 3, axis=1))   # window [j, j+6]
    pooled = pltpu.roll(c3, shift=PAD, axis=1)                  # window [j-3, j+3]

    rep = rep_ref[0]
    rel = rel_ref[0]
    maxima = (rep == pooled[:, 0:W]) & (rep >= REP_THR) & (rel >= REL_THR)
    out_ref[0] = maxima.astype(jnp.int8)


def nms_mask(reliability, repeatability):
    """reliability/repeatability: (B, C, H, W) float32 (NCHW). Returns bool mask."""
    B, C, H, W = repeatability.shape
    assert reliability.shape == repeatability.shape
    BC = B * C
    rel = reliability.reshape(BC, H, W).astype(jnp.float32)
    rep = repeatability.reshape(BC, H, W).astype(jnp.float32)

    # Scratch plane: >=3-row -inf halo above (sublane-aligned at 8) and below,
    # >=3-col -inf halo on the right (lane roll wrap re-uses it for the left).
    HP = TOP + _round_up(H + PAD, 8)
    WP = _round_up(W + PAD, 128)

    # VMEM limit derived from the chip (v7x has only 64 MiB/core); keep headroom.
    try:
        cap = int(pltpu.get_tpu_info().vmem_capacity_bytes)
    except Exception:
        cap = 64 * 1024 * 1024
    vmem_limit = max(16 * 1024 * 1024, min(cap * 3 // 4, 96 * 1024 * 1024))

    mask = pl.pallas_call(
        _nms_kernel,
        out_shape=jax.ShapeDtypeStruct((BC, H, W), jnp.int8),
        grid=(BC,),
        in_specs=[
            pl.BlockSpec((1, H, W), lambda i: (i, 0, 0)),   # reliability (unpadded)
            pl.BlockSpec((1, H, W), lambda i: (i, 0, 0)),   # repeatability (unpadded)
        ],
        out_specs=pl.BlockSpec((1, H, W), lambda i: (i, 0, 0)),
        scratch_shapes=[
            pltpu.VMEM((HP, WP), jnp.float32),
            pltpu.VMEM((HP, WP), jnp.float32),
        ],
        compiler_params=pltpu.CompilerParams(
            dimension_semantics=("parallel",),
            vmem_limit_bytes=vmem_limit,
        ),
    )(rel, rep)

    return mask.reshape(B, C, H, W).astype(bool)


def non_max_suppression(reliability, repeatability):
    """Mirrors NonMaxSuppression.forward: lists of length 1 with NCHW tensors."""
    assert len(reliability) == len(repeatability) == 1
    rel, rep = reliability[0], repeatability[0]
    maxima = nms_mask(rel, rep)
    # Dynamic-shape nonzero is glue (eager JAX): .nonzero().t()[2:4] == (y, x) rows.
    idx = jnp.nonzero(maxima)                 # tuple of 4 index arrays (b, c, y, x)
    return jnp.stack(idx)[2:4]                # (2, N)


if __name__ == "__main__":
    key = jax.random.PRNGKey(0)
    k1, k2 = jax.random.split(key)
    B, C, H, W = 2, 4, 16, 16
    reliability = jax.random.uniform(k1, (B, C, H, W), dtype=jnp.float32)
    repeatability = jax.random.uniform(k2, (B, C, H, W), dtype=jnp.float32)

    coords = non_max_suppression([reliability], [repeatability])
    jax.block_until_ready(coords)

    # Sanity check against a pure-JAX reference of the mask computation.
    def ref_mask(rel, rep):
        padded = jnp.pad(rep, ((0, 0), (0, 0), (PAD, PAD), (PAD, PAD)),
                         constant_values=-jnp.inf)
        pooled = lax.reduce_window(padded, -jnp.inf, lax.max,
                                   (1, 1, 7, 7), (1, 1, 1, 1), "VALID")
        return (rep == pooled) & (rep >= REP_THR) & (rel >= REL_THR)

    m_kernel = nms_mask(reliability, repeatability)
    m_ref = ref_mask(reliability, repeatability)
    assert bool(jnp.all(m_kernel == m_ref)), "mask mismatch vs reference"

    print("KERNEL_OK")
</pallas_src>

<mosaic_0001>
module attributes {stable_mosaic.version = 11 : i64} {
  func.func @_nms_kernel(%arg0: i32, %arg1: memref<1x16x16xf32, #tpu.memory_space<vmem>>, %arg2: memref<1x16x16xf32, #tpu.memory_space<vmem>>, %arg3: memref<1x16x16xi8, #tpu.memory_space<vmem>>, %arg4: memref<32x128xf32, #tpu.memory_space<vmem>>, %arg5: memref<32x128xf32, #tpu.memory_space<vmem>>) attributes {dimension_semantics = [#tpu.dimension_semantics<parallel>], iteration_bounds = array<i64: 8>, scalar_prefetch = 0 : i64, scratch_operands = 2 : i64, tpu.core_type = #tpu.core_type<tc>, window_params = [{transform_indices = @transform_0, window_bounds = array<i64: 1, 16, 16>}, {transform_indices = @transform_1, window_bounds = array<i64: 1, 16, 16>}, {transform_indices = @transform_2, window_bounds = array<i64: 1, 16, 16>}]} {
    %cst = arith.constant 0xFF800000 : f32
    %0 = vector.broadcast %cst : f32 to vector<8x128xf32>
    %c0 = arith.constant 0 : index
    %c0_0 = arith.constant 0 : index
    %1 = vector.load %arg4[%c0, %c0_0] : memref<32x128xf32, #tpu.memory_space<vmem>>, vector<8x128xf32>
    tpu.vector_store %arg4[%c0, %c0_0], %0 {strides = array<i32>} : memref<32x128xf32, #tpu.memory_space<vmem>>, vector<8x128xf32>,
    %cst_1 = arith.constant 0xFF800000 : f32
    %2 = vector.broadcast %cst_1 : f32 to vector<8x128xf32>
    %c24 = arith.constant 24 : index
    %c0_2 = arith.constant 0 : index
    %3 = vector.load %arg4[%c24, %c0_2] : memref<32x128xf32, #tpu.memory_space<vmem>>, vector<8x128xf32>
    tpu.vector_store %arg4[%c24, %c0_2], %2 {strides = array<i32>} : memref<32x128xf32, #tpu.memory_space<vmem>>, vector<8x128xf32>,
    %cst_3 = arith.constant 0xFF800000 : f32
    %4 = vector.broadcast %cst_3 : f32 to vector<16x128xf32>
    %c8 = arith.constant 8 : index
    %c0_4 = arith.constant 0 : index
    %5 = vector.load %arg4[%c8, %c0_4] : memref<32x128xf32, #tpu.memory_space<vmem>>, vector<16x128xf32>
    tpu.vector_store %arg4[%c8, %c0_4], %4 {strides = array<i32>} : memref<32x128xf32, #tpu.memory_space<vmem>>, vector<16x128xf32>,
    %c0_5 = arith.constant 0 : index
    %c0_6 = arith.constant 0 : index
    %c0_7 = arith.constant 0 : index
    %6 = vector.load %arg2[%c0_5, %c0_6, %c0_7] : memref<1x16x16xf32, #tpu.memory_space<vmem>>, vector<1x16x16xf32>
    %7 = vector.shape_cast %6 : vector<1x16x16xf32> to vector<16x16xf32>
    %c8_8 = arith.constant 8 : index
    %c0_9 = arith.constant 0 : index
    %8 = vector.load %arg4[%c8_8, %c0_9] : memref<32x128xf32, #tpu.memory_space<vmem>>, vector<16x16xf32>
    tpu.vector_store %arg4[%c8_8, %c0_9], %7 {strides = array<i32>} : memref<32x128xf32, #tpu.memory_space<vmem>>, vector<16x16xf32>,
    %c0_10 = arith.constant 0 : index
    %c0_11 = arith.constant 0 : index
    %9 = vector.load %arg4[%c0_10, %c0_11] : memref<32x128xf32, #tpu.memory_space<vmem>>, vector<31x128xf32>
    %c1 = arith.constant 1 : index
    %c0_12 = arith.constant 0 : index
    %10 = vector.load %arg4[%c1, %c0_12] : memref<32x128xf32, #tpu.memory_space<vmem>>, vector<31x128xf32>
    %11 = arith.maximumf %9, %10 : vector<31x128xf32>
    %c0_13 = arith.constant 0 : index
    %c0_14 = arith.constant 0 : index
    %12 = vector.load %arg5[%c0_13, %c0_14] : memref<32x128xf32, #tpu.memory_space<vmem>>, vector<31x128xf32>
    tpu.vector_store %arg5[%c0_13, %c0_14], %11 {strides = array<i32>} : memref<32x128xf32, #tpu.memory_space<vmem>>, vector<31x128xf32>,
    %c0_15 = arith.constant 0 : index
    %c0_16 = arith.constant 0 : index
    %13 = vector.load %arg5[%c0_15, %c0_16] : memref<32x128xf32, #tpu.memory_space<vmem>>, vector<29x128xf32>
    %c2 = arith.constant 2 : index
    %c0_17 = arith.constant 0 : index
    %14 = vector.load %arg5[%c2, %c0_17] : memref<32x128xf32, #tpu.memory_space<vmem>>, vector<29x128xf32>
    %15 = arith.maximumf %13, %14 : vector<29x128xf32>
    %c0_18 = arith.constant 0 : index
    %c0_19 = arith.constant 0 : index
    %16 = vector.load %arg4[%c0_18, %c0_19] : memref<32x128xf32, #tpu.memory_space<vmem>>, vector<29x128xf32>
    tpu.vector_store %arg4[%c0_18, %c0_19], %15 {strides = array<i32>} : memref<32x128xf32, #tpu.memory_space<vmem>>, vector<29x128xf32>,
    %c0_20 = arith.constant 0 : index
    %c0_21 = arith.constant 0 : index
    %17 = vector.load %arg4[%c0_20, %c0_21] : memref<32x128xf32, #tpu.memory_space<vmem>>, vector<26x128xf32>
    %c3 = arith.constant 3 : index
    %c0_22 = arith.constant 0 : index
    %18 = vector.load %arg4[%c3, %c0_22] : memref<32x128xf32, #tpu.memory_space<vmem>>, vector<26x128xf32>
    %19 = arith.maximumf %17, %18 : vector<26x128xf32>
    %c0_23 = arith.constant 0 : index
    %c0_24 = arith.constant 0 : index
    %20 = vector.load %arg5[%c0_23, %c0_24] : memref<32x128xf32, #tpu.memory_space<vmem>>, vector<26x128xf32>
    tpu.vector_store %arg5[%c0_23, %c0_24], %19 {strides = array<i32>} : memref<32x128xf32, #tpu.memory_space<vmem>>, vector<26x128xf32>,
    %c5 = arith.constant 5 : index
    %c0_25 = arith.constant 0 : index
    %21 = vector.load %arg5[%c5, %c0_25] : memref<32x128xf32, #tpu.memory_space<vmem>>, vector<16x128xf32>
    %c127_i32 = arith.constant 127 : i32
    %22 = tpu.dynamic_rotate %21 by %c127_i32 dim 1 : vector<16x128xf32>, i32 -> vector<16x128xf32>
    %23 = arith.maximumf %21, %22 : vector<16x128xf32>
    %c126_i32 = arith.constant 126 : i32
    %24 = tpu.dynamic_rotate %23 by %c126_i32 dim 1 : vector<16x128xf32>, i32 -> vector<16x128xf32>
    %25 = arith.maximumf %23, %24 : vector<16x128xf32>
    %c125_i32 = arith.constant 125 : i32
    %26 = tpu.dynamic_rotate %25 by %c125_i32 dim 1 : vector<16x128xf32>, i32 -> vector<16x128xf32>
    %27 = arith.maximumf %25, %26 : vector<16x128xf32>
    %c3_i32 = arith.constant 3 : i32
    %28 = tpu.dynamic_rotate %27 by %c3_i32 dim 1 : vector<16x128xf32>, i32 -> vector<16x128xf32>
    %c0_26 = arith.constant 0 : index
    %c0_27 = arith.constant 0 : index
    %c0_28 = arith.constant 0 : index
    %29 = vector.load %arg2[%c0_26, %c0_27, %c0_28] : memref<1x16x16xf32, #tpu.memory_space<vmem>>, vector<1x16x16xf32>
    %30 = vector.shape_cast %29 : vector<1x16x16xf32> to vector<16x16xf32>
    %c0_29 = arith.constant 0 : index
    %c0_30 = arith.constant 0 : index
    %c0_31 = arith.constant 0 : index
    %31 = vector.load %arg1[%c0_29, %c0_30, %c0_31] : memref<1x16x16xf32, #tpu.memory_space<vmem>>, vector<1x16x16xf32>
    %32 = vector.shape_cast %31 : vector<1x16x16xf32> to vector<16x16xf32>
    %33 = vector.extract_strided_slice %28 {offsets = [0, 0], sizes = [16, 16], strides = [1, 1]} : vector<16x128xf32> to vector<16x16xf32>
    %34 = arith.cmpf oeq, %30, %33 : vector<16x16xf32>
    %cst_32 = arith.constant 0.699999988 : f32
    %35 = vector.broadcast %cst_32 : f32 to vector<16x16xf32>
    %36 = arith.cmpf oge, %30, %35 : vector<16x16xf32>
    %37 = arith.andi %34, %36 : vector<16x16xi1>
    %cst_33 = arith.constant 0.699999988 : f32
    %38 = vector.broadcast %cst_33 : f32 to vector<16x16xf32>
    %39 = arith.cmpf oge, %32, %38 : vector<16x16xf32>
    %40 = arith.andi %37, %39 : vector<16x16xi1>
    %41 = arith.extui %40 : vector<16x16xi1> to vector<16x16xi8>
    %c0_34 = arith.constant 0 : index
    %c0_35 = arith.constant 0 : index
    %c0_36 = arith.constant 0 : index
    %42 = vector.load %arg3[%c0_34, %c0_35, %c0_36] : memref<1x16x16xi8, #tpu.memory_space<vmem>>, vector<1x16x16xi8>
    %43 = vector.shape_cast %42 : vector<1x16x16xi8> to vector<16x16xi8>
    %44 = vector.shape_cast %41 : vector<16x16xi8> to vector<1x16x16xi8>
    tpu.vector_store %arg3[%c0_34, %c0_35, %c0_36], %44 {strides = array<i32>} : memref<1x16x16xi8, #tpu.memory_space<vmem>>, vector<1x16x16xi8>,
    return
  }
  func.func @transform_0(%arg0: i32) -> (i32, i32, i32) {
    %c0_i32 = arith.constant 0 : i32
    %c0_i32_0 = arith.constant 0 : i32
    %c0_i32_1 = arith.constant 0 : i32
    return %arg0, %c0_i32, %c0_i32_0 : i32, i32, i32
  }
  func.func @transform_1(%arg0: i32) -> (i32, i32, i32) {
    %c0_i32 = arith.constant 0 : i32
    %c0_i32_0 = arith.constant 0 : i32
    %c0_i32_1 = arith.constant 0 : i32
    return %arg0, %c0_i32, %c0_i32_0 : i32, i32, i32
  }
  func.func @transform_2(%arg0: i32) -> (i32, i32, i32) {
    %c0_i32 = arith.constant 0 : i32
    %c0_i32_0 = arith.constant 0 : i32
    %c0_i32_1 = arith.constant 0 : i32
    return %arg0, %c0_i32, %c0_i32_0 : i32, i32, i32
  }
}

</mosaic_0001>

<bundles_post_ra>
// kernel: tpu_custom_call.1
= control target key start
LH: loop header
LB: loop body
LE: loop exit
PB: predicated region body
PF: predicated region fallthrough
CT: control target
= control target key end

     0   :  { %7 = vsyncpa [#allocation5], 0  ;;  %s899_s0 = inlined_call_operand.hbm [shape: f32[8,16,16], index: 0, kind: input, shape index: {}]   ;;  %s900_s1 = inlined_call_operand.hbm [shape: f32[8,16,16], index: 1, kind: input, shape index: {}]   ;;  %s901_s2 = inlined_call_operand.hbm [shape: s8[8,16,16], index: 2, kind: output, shape index: {}]  }
   0x1   :  { %9 = vsyncpa [#allocation5 + $0x1], 0 }
   0x2   :  { %10 = vsyncpa [#allocation8], 0 }
   0x3   :  { %12 = vsyncpa [#allocation8 + $0x1], 0 }
   0x4   :  { %13 = vsyncpa [#allocation6], 0 }
   0x5   :  { %15 = vsyncpa [#allocation6 + $0x1], 0  ;;  %s663_s9 = smov 0   ;;  %s665_s10 = smov 0  }
   0x6   :  { %s667_s11 = smov 0   ;;  %s669_s12 = smov 0  }
   0x7 LB: > { %s684_s13 = sadd.s32 4294967295, %s633_s12   ;;  %s421_s14 = sadd.s32 4294967294, %s633_s12   ;;  %s633_s12 = sphi %s669_s12, %s916_s12   ;;  %s629_s11 = sphi %s667_s11, %s915_s11   ;;  %s625_s10 = sphi %s665_s10, %s914_s10   ;;  %s621_s9 = sphi %s663_s9, %s913_s9  }
   0x8   : > { %s688_s15 = sadd.s32 1, %s633_s12   ;;  %s28_s16 = sadd.s32 1, %s629_s11 }
   0x9   : > { %s25_s17 = ssub.s32 %s633_s12, %s688_s15  ;;  %p35_p0 = scmp.ne.s32.totalorder %s629_s11, %s625_s10 }
   0xa   : > { %p26_p1 = scmp.eq.s32.totalorder %s25_s17, 0  ;;  %p36_p2 = scmp.eq.s32.totalorder %s633_s12, 0 }
   0xb   : > { %p41_p3 = scmp.ne.s32.totalorder %s625_s10, %s621_s9  ;;  %p42_p4 = scmp.eq.s32.totalorder %s684_s13, 0 }
   0xc   : > { %s700_s18 = scalar_select %p26_p1, %s629_s11, %s28_s16  }
   0xd   : > { %p702_p5 = por %p36_p2, %p35_p0  ;;  %p706_p6 = por %p42_p4, %p41_p3 }
   0xe   : > { %p91_p7 = scmp.eq.s32.totalorder %s684_s13, 7  ;;  %p97_p8 = scmp.eq.s32.totalorder %s421_s14, 7 }
   0xf   : > { %s905_s20 = scalar_select %p706_p6, 1, 0 }
  0x10   : > { %p459_p9 = scmp.lt.s32.totalorder %s633_s12, 8  ;;  %p712_p10 = por %p91_p7, %p35_p0 }
  0x11   : > { %p716_p11 = por %p97_p8, %p41_p3  ;;  %s721_s23 = sand.u32 1, %s629_s11  }
  0x12   : > { %s906_s21 = scalar_select %p712_p10, 1, 0 }
  0x13   : > { %s907_s22 = scalar_select %p716_p11, 1, 0 }
  0x14   : > { %s439_s24 = sshll.u32 %s633_s12, 8  ;;  %s424_s25 = sshll.u32 %s721_s23, 4 }
  0x15   : > { %s730_s28 = scalar_lea.hbm %s899_s0, %s439_s24  ;;  %s121_s29 = scalar_lea.vmem [#allocation4], %s424_s25 }
  0x16   : > { %s128_s30 = sshll.u32 %s121_s29, 4  ;;  %p736_p12 = pnand %p459_p9, %p702_p5  ;;  %s740_s30 = int_to_ptr.vmem [resolvable:$true] %s128_s30 }
  0x17   : > { %s118_s4 = scalar_lea.sflag [#allocation5], %s721_s23  ;;  %s503_s5 = scalar_lea.hbm %s730_s28, 256 }
  0x18   : > { %p504_p13 = scmp.ne.s32.totalorder %s730_s28, %s503_s5  ;;  %p505_p0 = pneg %p736_p12 }
  0x19   : > { %s508_s8 = scalar_lea.hbm %s899_s0, 2048  ;;  %p509_p3 = scmp.lt.u32.totalorder %s730_s28, %s899_s0 }
  0x1a   : > { %p506_p1 = pnand %p505_p0, %p504_p13  ;;  %p510_p4 = scmp.lt.u32.totalorder %s508_s8, %s503_s5 }
  0x1b   : > { %p512_p7 = scmp.lt.u32.totalorder %s503_s5, %s730_s28 }
  0x1c   : > { %p507_p2 = pneg %p506_p1  ;;  %p511_p5 = por %p510_p4, %p509_p3 }
  0x1e   : > { %p513_p8 = por %p512_p7, %p511_p5 }
  0x20   : > { %p514_p9 = pnand %p513_p8, %p507_p2 }
  0x22   : > { %517 = shalt.err (!%p514_p9)
}
  0x23   : > { %s518_s17 = scalar_lea.vmem %s740_s30, 256  ;;  %s635_s19 = smov [#allocation4]  }
  0x24   : > { %p519_p13 = scmp.ne.s32.totalorder %s740_s30, %s518_s17  ;;  %s523_s26 = sshll.u32 %s635_s19, 4  ;;  %s524_s26 = int_to_ptr.vmem [resolvable:$false] %s523_s26 }
  0x25   : > { %s525_s27 = scalar_lea.vmem %s524_s26, 512  ;;  %p526_p10 = scmp.lt.s32.totalorder %s740_s30, %s524_s26 }
  0x26   : > { %p521_p1 = pnand %p519_p13, %p505_p0  ;;  %p527_p3 = scmp.lt.s32.totalorder %s525_s27, %s518_s17 }
  0x28   : > { %p522_p11 = pneg %p521_p1  ;;  %p528_p4 = por %p527_p3, %p526_p10 }
  0x2a   : > { %p529_p5 = pnand %p528_p4, %p522_p11 }
  0x2c   : > { %532 = shalt.err (!%p529_p5)
}
  0x2d   : > { %s636_s29 = smov 128   ;;  %s637_s5 = smov 8  }
  0x2e   : > { %451 = dma.hbm_to_vmem [thread:$0]  (!%p736_p12), %s730_s28, 256, %s740_s30, %s118_s4, %s636_s29, %s636_s29, %s637_s5  }
  0x2f   : > { %p430_p10 = scmp.ge.s32.totalorder %s633_s12, 1  ;;  %p157_p11 = scmp.lt.s32.totalorder %s633_s12, 9 }
  0x30   : > { %s784_s14 = scalar_lea.hbm %s900_s1, %s439_s24  ;;  %s142_s16 = scalar_lea.vmem [#allocation7], %s424_s25 }
  0x31   : > { %p775_p2 = pnand %p430_p10, %p157_p11  ;;  %s149_s17 = sshll.u32 %s142_s16, 4  ;;  %s788_s17 = int_to_ptr.vmem [resolvable:$true] %s149_s17 }
  0x32   : > { %s139_s28 = scalar_lea.sflag [#allocation8], %s721_s23  ;;  %s533_s30 = scalar_lea.hbm %s784_s14, 256 }
  0x33   : > { %p534_p7 = scmp.ne.s32.totalorder %s784_s14, %s533_s30  ;;  %s538_s24 = scalar_lea.hbm %s900_s1, 2048 }
  0x34   : > { %p539_p13 = scmp.lt.u32.totalorder %s784_s14, %s900_s1  ;;  %p540_p1 = scmp.lt.u32.totalorder %s538_s24, %s533_s30 }
  0x35   : > { %p536_p8 = pnand %p534_p7, %p505_p0  ;;  %p542_p4 = scmp.lt.u32.totalorder %s533_s30, %s784_s14 }
  0x36   : > { %p541_p3 = por %p540_p1, %p539_p13 }
  0x37   : > { %p537_p9 = pneg %p536_p8 }
  0x38   : > { %p543_p5 = por %p542_p4, %p541_p3 }
  0x3a   : > { %p544_p10 = pnand %p543_p5, %p537_p9 }
  0x3c   : > { %547 = shalt.err (!%p544_p10)
}
  0x3d   : > { %s548_s25 = scalar_lea.vmem %s788_s17, 256  ;;  %s638_s7 = smov [#allocation7]  }
  0x3e   : > { %p549_p11 = scmp.ne.s32.totalorder %s788_s17, %s548_s25  ;;  %s553_s8 = sshll.u32 %s638_s7, 4  ;;  %s554_s8 = int_to_ptr.vmem [resolvable:$false] %s553_s8 }
  0x3f   : > { %s555_s16 = scalar_lea.vmem %s554_s8, 512  ;;  %p556_p6 = scmp.lt.s32.totalorder %s788_s17, %s554_s8 }
  0x40   : > { %p551_p7 = pnand %p549_p11, %p505_p0  ;;  %p557_p13 = scmp.lt.s32.totalorder %s555_s16, %s548_s25 }
  0x42   : > { %p552_p8 = pneg %p551_p7  ;;  %p558_p1 = por %p557_p13, %p556_p6 }
  0x44   : > { %p559_p3 = pnand %p558_p1, %p552_p8 }
  0x46   : > { %562 = shalt.err (!%p559_p3)
}
  0x47   : > { %454 = dma.hbm_to_vmem [thread:$0]  (!%p736_p12), %s784_s14, 256, %s788_s17, %s139_s28, %s636_s29, %s636_s29, %s637_s5  }
  0x48   : > { %161 = sbr.rel (%p775_p2) target bundleno = 622 (0x26e), region = 28  ;;  %s822_s30 = sand.u32 (!%p775_p2), 1, %s625_s10  }
  0x49   : > { %s431_s4 = sshll.u32 (!%p775_p2), %s822_s30, 4  ;;  %s164_s19 = scalar_lea.sflag (!%p775_p2), [#allocation5], %s822_s30 }
  0x4a   : > { %s826_s3 = scalar_lea.vmem (!%p775_p2), [#allocation4], %s431_s4  ;;  %p910_p6 = scmp.ne.s32.totalorder (!%p775_p2), %s905_s20, 0 }
  0x4f   : > { %608 = dma.done.wait (%p910_p6), %s164_s19, 256  }
  0x50   : > { %610 = vsyncadd (%p910_p6), %s164_s19, 4294967040  ;;  %s173_s23 = scalar_lea.sflag [#allocation8], %s822_s30  ;;  %s176_s29 = scalar_lea.vmem [#allocation7], %s431_s4 }
  0x51   : > { %612 = dma.done.wait (%p910_p6), %s173_s23, 256  }
  0x52   : > { %614 = vsyncadd (%p910_p6), %s173_s23, 4294967040  ;;  %v639_v0 = vmov -inf   ;;  %vm210_vm0 = vcmask 130048   ;;  %v837_v1 = vld [vmem:[%s176_s29] sm:$0xff]  ;;  %v839_v2 = vld [vmem:[%s176_s29 + $0x8] sm:$0xff]  ;;  %s640_s20 = smov 127  }
  0x53   : > { %204 = vst [vmem:[#allocation2] sm:$0xff] %v639_v0  ;;  %205 = vst [vmem:[#allocation2 + $0x18] sm:$0xff] %v639_v0  ;;  %s641_s5 = smov 126   ;;  %s642_s6 = smov 125   ;;  %v287_v45 = vld [vmem:[%s826_s3] sm:$0xff]  ;;  %v288_v47 = vld [vmem:[%s826_s3 + $0x8] sm:$0xff] }
  0x54   : > { %206 = vst [vmem:[#allocation2 + $0x8] sm:$0xff] %v639_v0  ;;  %207 = vst [vmem:[#allocation2 + $0x10] sm:$0xff] %v639_v0  ;;  %s643_s14 = smov 3   ;;  %vm291_vm1 = vcmp.ge.f32.partialorder %v837_v1, 0.7  ;;  %s433_s17 = sshll.u32 %s822_s30, 2 }
  0x55   : > { %211 = vst.msk [vmem:[#allocation2 + $0x8] sm:$0xff] %vm210_vm0, %v837_v1  ;;  %212 = vst.msk [vmem:[#allocation2 + $0x10] sm:$0xff] %vm210_vm0, %v839_v2  ;;  %vm295_vm3 = vcmp.ge.f32.partialorder %v287_v45, 0.7  ;;  %vm292_vm5 = vcmp.ge.f32.partialorder %v839_v2, 0.7 }
  0x56   : > { %vm296_vm6 = vcmp.ge.f32.partialorder %v288_v47, 0.7  ;;  %v644_v49 = vmov 0   ;;  %s441_s28 = sshll.u32 %s684_s13, 6  ;;  %s201_s24 = scalar_lea.vmem [#allocation9], %s433_s17  ;;  %vm308_vm13 = vcmask 123904  }
  0x57   : > { %s325_s26 = sshll.u32 %s201_s24, 4  ;;  %s854_s7 = scalar_lea.hbm %s901_s2, %s441_s28  ;;  %s856_s26 = int_to_ptr.vmem [resolvable:$true] %s325_s26 }
  0x58   : > { %s312_s13 = scalar_lea.sflag [#allocation6], %s822_s30  ;;  %s563_s8 = scalar_lea.vmem %s856_s26, 64 }
  0x59   : > { %p564_p12 = scmp.ne.s32.totalorder %s856_s26, %s563_s8  ;;  %p911_p0 = scmp.ne.s32.totalorder %s906_s21, 0 }
  0x5a   : > { %v216_v3 = vld [vmem:[#allocation2 + $0x18] sm:$0x7f]  ;;  %s645_s16 = smov [#allocation9]  }
  0x5b   : > { %v220_v4 = vld [vmem:[#allocation2 + $0x19] sm:$0x7f]  ;;  %p565_p2 = pnand %p564_p12, %p911_p0  ;;  %s567_s4 = sshll.u32 %s645_s16, 4  ;;  %s568_s4 = int_to_ptr.vmem [resolvable:$false] %s567_s4 }
  0x5c   : > { %v224_v5 = vmax.f32 %v216_v3, %v220_v4  ;;  %v214_v6 = vld [vmem:[#allocation2 + $0x8] sm:$0xff]  ;;  %v215_v7 = vld [vmem:[#allocation2 + $0x10] sm:$0xff]  ;;  %s569_s19 = scalar_lea.vmem %s568_s4, 128  ;;  %p570_p4 = scmp.lt.s32.totalorder %s856_s26, %s568_s4 }
  0x5d   : > { %v217_v8 = vld [vmem:[#allocation2 + $0x1] sm:$0xff]  ;;  %v218_v9 = vld [vmem:[#allocation2 + $0x9] sm:$0xff]  ;;  %v219_v10 = vld [vmem:[#allocation2 + $0x11] sm:$0xff]  ;;  %p566_p9 = pneg %p565_p2  ;;  %p571_p5 = scmp.lt.s32.totalorder %s569_s19, %s563_s8 }
  0x5e   : > { %228 = vst [vmem:[#allocation3 + $0x18] sm:$0x7f] %v224_v5  ;;  %v222_v11 = vmax.f32 %v214_v6, %v218_v9  ;;  %v223_v12 = vmax.f32 %v215_v7, %v219_v10  ;;  %225 = vst [vmem:[#allocation3] sm:$0xff] %v217_v8 }
  0x5f   : > { %p572_p10 = por %p571_p5, %p570_p4 }
  0x60   : > { %226 = vst [vmem:[#allocation3 + $0x8] sm:$0xff] %v222_v11  ;;  %227 = vst [vmem:[#allocation3 + $0x10] sm:$0xff] %v223_v12 }
  0x61   : > { %p573_p11 = pnand %p572_p10, %p566_p9 }
  0x65   : > { %v232_v13 = vld [vmem:[#allocation3 + $0x18] sm:$0x1f] }
  0x66   : > { %v236_v14 = vld [vmem:[#allocation3 + $0x1a] sm:$0x1f] }
  0x67   : > { %v240_v15 = vmax.f32 %v232_v13, %v236_v14  ;;  %v233_v16 = vld [vmem:[#allocation3 + $0x2] sm:$0xff]  ;;  %v234_v17 = vld [vmem:[#allocation3 + $0xa] sm:$0xff]  ;;  %v235_v18 = vld [vmem:[#allocation3 + $0x12] sm:$0xff] }
  0x68   : > { %v237_v19 = vmax.f32 %v217_v8, %v233_v16  ;;  %v238_v20 = vmax.f32 %v222_v11, %v234_v17  ;;  %v239_v21 = vmax.f32 %v223_v12, %v235_v18 }
  0x69   : > { %244 = vst [vmem:[#allocation2 + $0x18] sm:$0x1f] %v240_v15 }
  0x6a   : > { %241 = vst [vmem:[#allocation2] sm:$0xff] %v237_v19  ;;  %242 = vst [vmem:[#allocation2 + $0x8] sm:$0xff] %v238_v20 }
  0x6b   : > { %243 = vst [vmem:[#allocation2 + $0x10] sm:$0xff] %v239_v21 }
  0x70   : > { %v248_v22 = vld [vmem:[#allocation2 + $0x18] sm:$0x3]  ;;  %v252_v23 = vld [vmem:[#allocation2 + $0x1b] sm:$0x3] }
  0x71   : > { %v256_v24 = vmax.f32 %v248_v22, %v252_v23  ;;  %v249_v25 = vld [vmem:[#allocation2 + $0x3] sm:$0xff] }
  0x72   : > { %v250_v26 = vld [vmem:[#allocation2 + $0xb] sm:$0xff]  ;;  %v251_v27 = vld [vmem:[#allocation2 + $0x13] sm:$0xff]  ;;  %v253_v28 = vmax.f32 %v237_v19, %v249_v25 }
  0x73   : > { %260 = vst [vmem:[#allocation3 + $0x18] sm:$0x3] %v256_v24  ;;  %v254_v29 = vmax.f32 %v238_v20, %v250_v26  ;;  %v255_v30 = vmax.f32 %v239_v21, %v251_v27 }
  0x74   : > { %257 = vst [vmem:[#allocation3] sm:$0xff] %v253_v28 }
  0x75   : > { %258 = vst [vmem:[#allocation3 + $0x8] sm:$0xff] %v254_v29  ;;  %259 = vst [vmem:[#allocation3 + $0x10] sm:$0xff] %v255_v30 }
  0x7c   : > { %v261_v31 = vld [vmem:[#allocation3 + $0x5] sm:$0xff]  ;;  %v262_v32 = vld [vmem:[#allocation3 + $0xd] sm:$0xff] }
  0x7d   : > { %263 = vrot.lane.b32.xlu0 %v261_v31, %s640_s20 }
  0x81   : > { %265 = vrot.lane.b32.xlu0 %v262_v32, %s640_s20 }
  0xef   : > { %v264_v33 = vpop.permute.xlu0 %263 }
  0xf0   : > { %v267_v34 = vmax.f32 %v261_v31, %v264_v33 }
  0xf2   : > { %269 = vrot.lane.b32.xlu1 %v267_v34, %s641_s5 }
  0xf3   : > { %v266_v35 = vpop.permute.xlu0 %265 }
  0xf4   : > { %v268_v36 = vmax.f32 %v262_v32, %v266_v35 }
  0xf6   : > { %271 = vrot.lane.b32.xlu1 %v268_v36, %s641_s5 }
 0x164   : > { %v270_v37 = vpop.permute.xlu1 %269 }
 0x165   : > { %v273_v38 = vmax.f32 %v267_v34, %v270_v37 }
 0x167   : > { %275 = vrot.lane.b32.xlu0 %v273_v38, %s642_s6 }
 0x168   : > { %v272_v39 = vpop.permute.xlu1 %271 }
 0x169   : > { %v274_v40 = vmax.f32 %v268_v36, %v272_v39 }
 0x16b   : > { %277 = vrot.lane.b32.xlu1 %v274_v40, %s642_s6 }
 0x1d9   : > { %v276_v41 = vpop.permute.xlu0 %275 }
 0x1da   : > { %v279_v42 = vmax.f32 %v273_v38, %v276_v41 }
 0x1dc   : > { %281 = vrot.lane.b32.xlu0 %v279_v42, %s643_s14 }
 0x1dd   : > { %v278_v43 = vpop.permute.xlu1 %277 }
 0x1de   : > { %v280_v44 = vmax.f32 %v274_v40, %v278_v43 }
 0x1e0   : > { %283 = vrot.lane.b32.xlu1 %v280_v44, %s643_s14 }
 0x24e   : > { %v282_v46 = vpop.permute.xlu0 %281 }
 0x24f   : > { %vm289_vm2 = vcmp.eq.f32.partialorder %v837_v1, %v282_v46 }
 0x250   : > { %vm293_vm4 = vmand %vm289_vm2, %vm291_vm1 }
 0x251   : > { %vm297_vm7 = vmand %vm293_vm4, %vm295_vm3 }
 0x252   : > { %v284_v48 = vpop.permute.xlu1 %283 }
 0x253   : > { %vm290_vm8 = vcmp.eq.f32.partialorder %v839_v2, %v284_v48 }
 0x254   : > { %vm294_vm9 = vmand %vm290_vm8, %vm292_vm5 }
 0x255   : > { %vm298_vm10 = vmand %vm294_vm9, %vm296_vm6 }
 0x256   : > { %vm299_vm11 = vmpackc.low %vm298_vm10, %vm297_vm7 }
 0x257   : > { %vm300_vm12 = vmpackc.even %vm299_vm11, %vm299_vm11 }
 0x258   : > { %v301_v50 = vsel %vm300_vm12, 16843009, %v644_v49 }
 0x259   : > { %v302_v51 = vunpack.c.0.s8 %v301_v50  ;;  %v303_v52 = vunpack.c.1.s8 %v301_v50 }
 0x25b   : > { %v304_v53 = vpack.c.b16 %v302_v51, %v302_v51  ;;  %v306_v54 = vpack.c.b16 %v303_v52, %v303_v52 }
 0x25d   : > { %v305_v55 = vpack.c.b8 %v304_v53, %v304_v53  ;;  %v307_v56 = vpack.c.b8 %v306_v54, %v306_v54 }
 0x25f   : > { %309 = vst.msk [vmem:[%s201_s24] sm:$0x3] %vm308_vm13, %v305_v55  ;;  %310 = vst.msk [vmem:[%s201_s24 + $0x2] sm:$0x3] %vm308_vm13, %v307_v56 }
 0x260   : > { %576 = shalt.err (!%p573_p11)
}
 0x261   : > { %s577_s3 = scalar_lea.hbm %s854_s7, 64  ;;  %s581_s20 = scalar_lea.hbm %s901_s2, 512 }
 0x262   : > { %p578_p7 = scmp.ne.s32.totalorder %s854_s7, %s577_s3  ;;  %p582_p1 = scmp.lt.u32.totalorder %s854_s7, %s901_s2 }
 0x263   : > { %p583_p3 = scmp.lt.u32.totalorder %s581_s20, %s577_s3  ;;  %p585_p12 = scmp.lt.u32.totalorder %s577_s3, %s854_s7 }
 0x264   : > { %p579_p8 = pnand %p578_p7, %p911_p0 }
 0x265   : > { %p584_p6 = por %p583_p3, %p582_p1 }
 0x266   : > { %p580_p13 = pneg %p579_p8 }
 0x267   : > { %p586_p2 = por %p585_p12, %p584_p6 }
 0x269   : > { %p587_p9 = pnand %p586_p2, %p580_p13 }
 0x26b   : > { %590 = shalt.err (!%p587_p9)
}
 0x26c   : > { %s646_s14 = smov 32   ;;  %s647_s17 = smov 2  }
 0x26d   : > { %446 = dma.vmem_to_hbm [thread:$0]  (%p911_p0), %s856_s26, 64, %s854_s7, %s312_s13, %s646_s14, %s646_s14, %s647_s17  }
 0x26e PF: > { %p460_p4 = scmp.ge.s32.totalorder %s633_s12, 2  ;;  %s340_s28 = sand.u32 1, %s621_s9  }
 0x26f   : > { %p912_p5 = scmp.ne.s32.totalorder %s907_s22, 0  ;;  %s341_s24 = scalar_lea.sflag [#allocation6], %s340_s28 }
 0x271   : > { %p456_p10 = pnand %p460_p4, %p912_p5 }
 0x273   : > { %616 = dma.done.wait (!%p456_p10), %s341_s24, 64  }
 0x274   : > { %618 = vsyncadd (!%p456_p10), %s341_s24, 4294967232  ;;  %p18_p11 = scmp.ge.s32.totalorder %s688_s15, 10   ;;  %s913_s9 = smov %s625_s10 }
 0x275   : > { %s914_s10 = smov %s629_s11  ;;  %s915_s11 = smov %s700_s18 }
 0x276   : > { %s916_s12 = smov %s688_s15  ;;  %20 = sbr.rel (!%p18_p11) target bundleno = 7 (0x7), region = 86 }
 0x27d   :  { %346 = vsyncpa [#allocation5], 1 }
 0x27e   :  { %348 = vsyncpa [#allocation5 + $0x1], 1 }
 0x27f   :  { %349 = vsyncpa [#allocation8], 1 }
 0x280   :  { %351 = vsyncpa [#allocation8 + $0x1], 1 }
 0x281   :  { %352 = vsyncpa [#allocation6], 1 }
 0x282   :  { %354 = vsyncpa [#allocation6 + $0x1], 1 }

</bundles_post_ra>
